<compile_context>
chip_gen: v6e
topology: v6e:2x2x1
jax: 0.10.0
libtpu: 0.0.40
codegen_flags: <defaults>
</compile_context>

<pallas_src>
import math

import jax
import jax.numpy as jnp
from jax import lax
from jax.experimental import pallas as pl
from jax.experimental.pallas import tpu as pltpu


def _round_up(x, m):
    return (x + m - 1) // m * m


# dot_general dimension numbers for A @ B.T (the flash-attention "q @ k.T"
# pattern) -- gives a lane-major (1, tb) result for the final N=1 layer.
_TRANS_B_DIM_NUMBERS = (((1,), (1,)), ((), ()))


# -----------------------------------------------------------------------------
# Parameter init (mirrors the PyTorch module) and packing.
# -----------------------------------------------------------------------------
def init_params(key, state_dim, action_dim, h1, h2):
    """Mirrors SmallMetaCritic.__init__.

    Weights stored as [in_features, out_features] (transposed vs. torch).
      - layer0 / layer2 weights: xavier_uniform (gain=1)
      - layer4 weight: uniform(-0.3, 0.3)
      - all biases: PyTorch Linear default uniform(-1/sqrt(fan_in), 1/sqrt(fan_in))
        (the module only re-initializes the *weights*, never the biases).
    """
    in0 = state_dim + action_dim
    keys = jax.random.split(key, 6)

    def xavier(k, fan_in, fan_out):
        limit = math.sqrt(6.0 / (fan_in + fan_out))
        return jax.random.uniform(
            k, (fan_in, fan_out), jnp.float32, minval=-limit, maxval=limit
        )

    def default_bias(k, fan_in, fan_out):
        bound = 1.0 / math.sqrt(fan_in)
        return jax.random.uniform(
            k, (1, fan_out), jnp.float32, minval=-bound, maxval=bound
        )

    w1 = xavier(keys[0], in0, h1)
    b1 = default_bias(keys[1], in0, h1)
    w2 = xavier(keys[2], h1, h2)
    b2 = default_bias(keys[3], h1, h2)
    w3 = jax.random.uniform(keys[4], (h2, 1), jnp.float32, minval=-0.3, maxval=0.3)
    b3 = default_bias(keys[5], h2, 1)
    return (w1, b1, w2, b2, w3, b3)


def pack_params(params, state_dim, action_dim):
    """Pack all weights/biases into one f32 (rows, width) buffer.

    Each segment starts at a multiple of 8 rows so every matmul operand inside
    the kernel is sublane-aligned.  w1 is stored as one CONTIGUOUS
    (state_dim + action_dim)-row segment so the fused single layer-1 matmul is
    valid for any state_dim (not only multiples of 8).  Layout:
        w1  [state_dim + action_dim, h1]
        b1  [1, h1]
        w2  [h1, h2]
        b2  [1, h2]
        w3  [1, h2]        (final layer as a row vector)
        b3  scalar at [row, 0]
    """
    w1, b1, w2, b2, w3, b3 = params
    in0 = state_dim + action_dim
    h1 = w1.shape[1]
    h2 = w2.shape[1]
    width = max(h1, h2)

    offsets = {}
    row = 0
    for name, nrows in (("w1", in0), ("b1", 1), ("w2", h1),
                        ("b2", 1), ("w3", 1), ("b3", 1)):
        offsets[name] = row
        row = _round_up(row + nrows, 8)
    rows = row

    packed = jnp.zeros((rows, width), jnp.float32)
    packed = packed.at[offsets["w1"]:offsets["w1"] + in0, :h1].set(w1)
    packed = packed.at[offsets["b1"], :h1].set(b1.reshape(h1))
    packed = packed.at[offsets["w2"]:offsets["w2"] + h1, :h2].set(w2)
    packed = packed.at[offsets["b2"], :h2].set(b2.reshape(h2))
    packed = packed.at[offsets["w3"], :h2].set(w3.reshape(h2))
    packed = packed.at[offsets["b3"], 0].set(b3.reshape(()))

    meta = dict(state_dim=state_dim, action_dim=action_dim, h1=h1, h2=h2,
                rows=rows, width=width, offsets=offsets)
    return packed, meta


# -----------------------------------------------------------------------------
# Kernel.
# -----------------------------------------------------------------------------
def _make_mlp_kernel(meta, use_bf16):
    sd, ad = meta["state_dim"], meta["action_dim"]
    in0 = sd + ad
    h1, h2 = meta["h1"], meta["h2"]
    o = meta["offsets"]
    cdt = jnp.bfloat16 if use_bf16 else jnp.float32

    def kernel(state_ref, action_ref, p_ref, out_ref):
        # Fused concat: lane-concatenate the two activation blocks (sd+ad lanes)
        # so layer 1 is a single K=sd+ad MXU matmul (one weight push / drain).
        x = jnp.concatenate([state_ref[...], action_ref[...]], axis=-1)

        # Static, sublane-aligned slices of the packed parameter buffer.
        w1 = p_ref[o["w1"]:o["w1"] + in0, :h1]
        b1 = p_ref[o["b1"]:o["b1"] + 1, :h1]
        w2 = p_ref[o["w2"]:o["w2"] + h1, :h2]
        b2 = p_ref[o["b2"]:o["b2"] + 1, :h2]
        w3 = p_ref[o["w3"]:o["w3"] + 1, :h2]        # final layer as a row vector
        b3 = p_ref[o["b3"]:o["b3"] + 1, 0:1]        # (1, 1) scalar

        # Layers 1 & 2: bf16 MXU operands, f32 accumulation, f32 tanh.
        z1 = jnp.dot(x.astype(cdt), w1.astype(cdt),
                     preferred_element_type=jnp.float32) + b1
        a1 = jnp.tanh(z1)
        z2 = jnp.dot(a1.astype(cdt), w2.astype(cdt),
                     preferred_element_type=jnp.float32) + b2
        a2 = jnp.tanh(z2)

        # Layer 3 (out_features=1): w3_row @ a2.T -> (1, tb).  The batch ends
        # up on the lane axis, so the store below is lane-dense (no vst.msk
        # single-lane partial stores, no 128x-padded output tile).
        out_row = lax.dot_general(w3.astype(cdt), a2.astype(cdt),
                                  _TRANS_B_DIM_NUMBERS,
                                  preferred_element_type=jnp.float32)
        out_ref[...] = (out_row + b3).reshape(out_ref.shape).astype(out_ref.dtype)

    return kernel


# -----------------------------------------------------------------------------
# Wrapper.
# -----------------------------------------------------------------------------
def _choose_batch_tile(B, block_b):
    tb_full = _round_up(B, 8)
    tb = min(block_b, tb_full)
    # v7x megacore: if the whole batch would fit one grid step but can be
    # split, use two steps so the "parallel" batch axis shards across both
    # TensorCores (near-zero per-step cost, up to 2x on mid-size batches).
    if tb >= tb_full and tb_full > 8:
        tb = _round_up((B + 1) // 2, 8)
    return tb


def small_meta_critic_forward(state, action, packed, meta, *,
                              block_b=4096, use_bf16=True):
    """error_estimate = MLP(cat([state, action], -1)); concat fused in-kernel."""
    B = state.shape[0]
    sd, ad = meta["state_dim"], meta["action_dim"]
    rows, width = meta["rows"], meta["width"]

    state = state.astype(jnp.float32)
    action = action.astype(jnp.float32)

    tb = _choose_batch_tile(B, block_b)
    Bp = _round_up(B, tb)
    if Bp != B:
        pad = Bp - B
        state = jnp.pad(state, ((0, pad), (0, 0)))
        action = jnp.pad(action, ((0, pad), (0, 0)))
    grid = Bp // tb

    # TODO(synk): for tiny latency-critical batches (B ~ 8) the cost is pure
    # dispatch + one ~12 KiB parameter DMA; keeping params resident across
    # calls needs the cross-call semaphore-future pattern (out of scope here).
    out = pl.pallas_call(
        _make_mlp_kernel(meta, use_bf16),
        out_shape=jax.ShapeDtypeStruct((grid, 1, tb), jnp.float32),
        grid=(grid,),
        in_specs=[
            pl.BlockSpec((tb, sd), lambda i: (i, 0)),
            pl.BlockSpec((tb, ad), lambda i: (i, 0)),
            # Constant index_map: one DMA, parameters stay resident in VMEM.
            pl.BlockSpec((rows, width), lambda i: (0, 0)),
        ],
        # Lane-dense output: one (1, tb) row of results per grid step.
        out_specs=pl.BlockSpec((1, 1, tb), lambda i: (i, 0, 0)),
        compiler_params=pltpu.CompilerParams(
            dimension_semantics=("parallel",),
            # Narrow blocks are lane-padded to 128 in VMEM; 32 MiB covers
            # block_b=4096 with headroom on v5e (16 MiB default scoped limit)
            # and stays within v7x's 64 MiB physical VMEM.
            vmem_limit_bytes=32 * 1024 * 1024,
        ),
    )(state, action, packed)

    # (grid, 1, tb) row-major == batch order; drop padded rows.
    return out.reshape(Bp, 1)[:B]


# -----------------------------------------------------------------------------
# Pure-JAX reference (matches the PyTorch forward).
# -----------------------------------------------------------------------------
def _reference(state, action, params):
    x = jnp.concatenate([state, action], axis=-1)
    w1, b1, w2, b2, w3, b3 = params
    h = jnp.tanh(x @ w1 + b1)
    h = jnp.tanh(h @ w2 + b2)
    return h @ w3 + b3


if __name__ == "__main__":
    # Small shapes consistent with the module's forward.
    batch = 8
    state_dim = 24
    action_dim = 8
    metacritic_h1 = 32
    metacritic_h2 = 32

    key = jax.random.PRNGKey(0)
    k_state, k_action, k_params, k_big = jax.random.split(key, 4)

    state = jax.random.normal(k_state, (batch, state_dim), jnp.float32)
    action = jax.random.normal(k_action, (batch, action_dim), jnp.float32)
    params = init_params(k_params, state_dim, action_dim,
                         metacritic_h1, metacritic_h2)
    packed, meta = pack_params(params, state_dim, action_dim)

    ref = _reference(state, action, params)

    # 1) Exact-f32 matmul path: tight structural check.
    out_f32 = small_meta_critic_forward(state, action, packed, meta,
                                        use_bf16=False)
    jax.block_until_ready(out_f32)
    assert out_f32.shape == (batch, 1), out_f32.shape
    assert jnp.allclose(out_f32, ref, atol=1e-4, rtol=1e-4), (out_f32, ref)

    # 2) Default bf16-MXU path (f32 accumulation): looser tolerance.
    out_bf16 = small_meta_critic_forward(state, action, packed, meta)
    jax.block_until_ready(out_bf16)
    assert out_bf16.shape == (batch, 1), out_bf16.shape
    assert jnp.allclose(out_bf16, ref, atol=5e-2, rtol=5e-2), (out_bf16, ref)

    # 3) Non-divisible batch: exercises multi-step grid, the two-TensorCore
    #    tile split, batch padding, and the multi-block lane-dense output.
    kb1, kb2 = jax.random.split(k_big)
    big_b = 300
    big_state = jax.random.normal(kb1, (big_b, state_dim), jnp.float32)
    big_action = jax.random.normal(kb2, (big_b, action_dim), jnp.float32)
    big_ref = _reference(big_state, big_action, params)
    big_out = small_meta_critic_forward(big_state, big_action, packed, meta,
                                        use_bf16=False)
    jax.block_until_ready(big_out)
    assert big_out.shape == (big_b, 1), big_out.shape
    assert jnp.allclose(big_out, big_ref, atol=1e-4, rtol=1e-4)

    print("KERNEL_OK")
</pallas_src>

<mosaic_0001>
module attributes {stable_mosaic.version = 11 : i64} {
  func.func @kernel(%arg0: i32, %arg1: memref<8x24xf32, #tpu.memory_space<vmem>>, %arg2: memref<8x8xf32, #tpu.memory_space<vmem>>, %arg3: memref<96x32xf32, #tpu.memory_space<vmem>>, %arg4: memref<1x1x8xf32, #tpu.memory_space<vmem>>) attributes {dimension_semantics = [#tpu.dimension_semantics<parallel>], iteration_bounds = array<i64: 1>, scalar_prefetch = 0 : i64, scratch_operands = 0 : i64, tpu.core_type = #tpu.core_type<tc>, window_params = [{transform_indices = @transform_0, window_bounds = array<i64: 8, 24>}, {transform_indices = @transform_1, window_bounds = array<i64: 8, 8>}, {pipeline_mode = #tpu.pipeline_mode<synchronous>, transform_indices = @transform_2, window_bounds = array<i64: 96, 32>}, {transform_indices = @transform_3, window_bounds = array<i64: 1, 1, 8>}]} {
    %c0 = arith.constant 0 : index
    %c0_0 = arith.constant 0 : index
    %0 = vector.load %arg1[%c0, %c0_0] : memref<8x24xf32, #tpu.memory_space<vmem>>, vector<8x24xf32>
    %c0_1 = arith.constant 0 : index
    %c0_2 = arith.constant 0 : index
    %1 = vector.load %arg2[%c0_1, %c0_2] : memref<8x8xf32, #tpu.memory_space<vmem>>, vector<8x8xf32>
    %2 = tpu.concatenate %0, %1 in 1 : vector<8x24xf32>, vector<8x8xf32> -> vector<8x32xf32>
    %c0_3 = arith.constant 0 : index
    %c0_4 = arith.constant 0 : index
    %3 = vector.load %arg3[%c0_3, %c0_4] : memref<96x32xf32, #tpu.memory_space<vmem>>, vector<32x32xf32>
    %c32 = arith.constant 32 : index
    %c0_5 = arith.constant 0 : index
    %4 = vector.load %arg3[%c32, %c0_5] : memref<96x32xf32, #tpu.memory_space<vmem>>, vector<1x32xf32>
    %c40 = arith.constant 40 : index
    %c0_6 = arith.constant 0 : index
    %5 = vector.load %arg3[%c40, %c0_6] : memref<96x32xf32, #tpu.memory_space<vmem>>, vector<32x32xf32>
    %c72 = arith.constant 72 : index
    %c0_7 = arith.constant 0 : index
    %6 = vector.load %arg3[%c72, %c0_7] : memref<96x32xf32, #tpu.memory_space<vmem>>, vector<1x32xf32>
    %c80 = arith.constant 80 : index
    %c0_8 = arith.constant 0 : index
    %7 = vector.load %arg3[%c80, %c0_8] : memref<96x32xf32, #tpu.memory_space<vmem>>, vector<1x32xf32>
    %c88 = arith.constant 88 : index
    %c0_9 = arith.constant 0 : index
    %8 = vector.load %arg3[%c88, %c0_9] : memref<96x32xf32, #tpu.memory_space<vmem>>, vector<1x1xf32>
    %cst = arith.constant dense<0.000000e+00> : vector<8x32xf32>
    %9 = tpu.matmul %2, %3, %cst {dimension_numbers = #tpu.dot_dimension_numbers<[1], [0], [0], [1], [0, 0, 1, 1], [], []>} : vector<8x32xf32>, vector<32x32xf32>, vector<8x32xf32> -> vector<8x32xf32>
    %10 = vector.broadcast %4 : vector<1x32xf32> to vector<8x32xf32>
    %11 = arith.addf %9, %10 : vector<8x32xf32>
    %12 = math.tanh %11 : vector<8x32xf32>
    %cst_10 = arith.constant dense<0.000000e+00> : vector<8x32xf32>
    %13 = tpu.matmul %12, %5, %cst_10 {dimension_numbers = #tpu.dot_dimension_numbers<[1], [0], [0], [1], [0, 0, 1, 1], [], []>} : vector<8x32xf32>, vector<32x32xf32>, vector<8x32xf32> -> vector<8x32xf32>
    %14 = vector.broadcast %6 : vector<1x32xf32> to vector<8x32xf32>
    %15 = arith.addf %13, %14 : vector<8x32xf32>
    %16 = math.tanh %15 : vector<8x32xf32>
    %cst_11 = arith.constant dense<0.000000e+00> : vector<1x8xf32>
    %17 = tpu.matmul %7, %16, %cst_11 {dimension_numbers = #tpu.dot_dimension_numbers<[1], [1], [0], [0], [0, 0, 1, 0], [], []>} : vector<1x32xf32>, vector<8x32xf32>, vector<1x8xf32> -> vector<1x8xf32>
    %18 = vector.broadcast %8 : vector<1x1xf32> to vector<1x8xf32>
    %19 = arith.addf %17, %18 : vector<1x8xf32>
    %20 = vector.shape_cast %19 : vector<1x8xf32> to vector<1x1x8xf32>
    %c0_12 = arith.constant 0 : index
    %c0_13 = arith.constant 0 : index
    %c0_14 = arith.constant 0 : index
    %21 = vector.load %arg4[%c0_12, %c0_13, %c0_14] : memref<1x1x8xf32, #tpu.memory_space<vmem>>, vector<1x1x8xf32>
    tpu.vector_store %arg4[%c0_12, %c0_13, %c0_14], %20 {strides = array<i32>} : memref<1x1x8xf32, #tpu.memory_space<vmem>>, vector<1x1x8xf32>,
    return
  }
  func.func @transform_0(%arg0: i32) -> (i32, i32) {
    %c0_i32 = arith.constant 0 : i32
    %c0_i32_0 = arith.constant 0 : i32
    return %arg0, %c0_i32 : i32, i32
  }
  func.func @transform_1(%arg0: i32) -> (i32, i32) {
    %c0_i32 = arith.constant 0 : i32
    %c0_i32_0 = arith.constant 0 : i32
    return %arg0, %c0_i32 : i32, i32
  }
  func.func @transform_2(%arg0: i32) -> (i32, i32) {
    %c0_i32 = arith.constant 0 : i32
    %c0_i32_0 = arith.constant 0 : i32
    %c0_i32_1 = arith.constant 0 : i32
    return %c0_i32, %c0_i32_0 : i32, i32
  }
  func.func @transform_3(%arg0: i32) -> (i32, i32, i32) {
    %c0_i32 = arith.constant 0 : i32
    %c0_i32_0 = arith.constant 0 : i32
    %c0_i32_1 = arith.constant 0 : i32
    return %arg0, %c0_i32, %c0_i32_0 : i32, i32, i32
  }
}

</mosaic_0001>

<bundles_post_ra>
// kernel: tpu_custom_call.1
= control target key start
LH: loop header
LB: loop body
LE: loop exit
PB: predicated region body
PF: predicated region fallthrough
CT: control target
= control target key end

     0   :  { %s366_s16 = smov 24   ;;  %v367_v2 = vmov 0.0   ;;  %vm368_vm0 = vmmov 0   ;;  %s443_s0 = inlined_call_operand.vmem [shape: f32[8,24], index: 0, kind: input, shape index: {}]   ;;  %s444_s1 = inlined_call_operand.vmem [shape: f32[8,8], index: 1, kind: input, shape index: {}]   ;;  %s445_s2 = inlined_call_operand.vmem [shape: f32[96,32], index: 2, kind: input, shape index: {}]   ;;  %s446_s3 = inlined_call_operand.hbm [shape: f32[1,1,8], index: 3, kind: output, shape index: {}]  }
   0x1   :  { %v16_v0 = vld [vmem:[%s444_s1] sm:$0xff]  ;;  %v26_v1 = vld [vmem:[%s445_s2 + $0x18] sm:$0xff]  ;;  %307 = vmatprep.subr.mxu0 %v367_v2  ;;  %v25_v3 = vld [vmem:[%s445_s2 + $0x10] sm:$0xff]  ;;  %315 = vmatprep.mubr.msk.f32.mxu0 %vm368_vm0, %v367_v2 }
   0x2   :  { %18 = vrot.lane.b32.xlu0 %v16_v0, %s366_s16  ;;  %308 = vmatpush3.msra.mxu0 %v26_v1 }
   0x3   :  { %8 = vsyncpa [#allocation3], 0  ;;  %309 = vmatprep.subr.mxu0 %v367_v2  ;;  %v24_v4 = vld [vmem:[%s445_s2 + $0x8] sm:$0xff]  ;;  %318 = vmatprep.subr.mxu1 %v367_v2  ;;  %v23_v5 = vld [vmem:[%s445_s2] sm:$0xff]  ;;  %vm21_vm1 = vcmask 195584   ;;  %vm39_vm2 = vcmask 261120  }
   0x4   :  { %310 = vmatpush3.msra.mxu0 %v25_v3  ;;  %326 = vmatprep.mubr.msk.f32.mxu1 %vm368_vm0, %v367_v2  ;;  %v15_v6 = vld [vmem:[%s443_s0] sm:$0xff]  ;;  %v30_v10 = vld [vmem:[%s445_s2 + $0x38] sm:$0xff]  ;;  %v29_v11 = vld [vmem:[%s445_s2 + $0x30] sm:$0xff]  ;;  %v369_v19 = vmov 0   ;;  %s370_s12 = smov [#allocation2]   ;;  %vm273_vm3 = vcmask 57344  }
   0x5   :  { %311 = vmatprep.subr.mxu0 %v367_v2  ;;  %v31_v9 = vld [vmem:[%s445_s2 + $0x40] sm:$0xff]  ;;  %v28_v12 = vld [vmem:[%s445_s2 + $0x28] sm:$0xff]  ;;  %v34_v18 = vld [vmem:[%s445_s2 + $0x58] sm:$0x1]  ;;  %339 = vset.pattern.permute.xlu0 %v369_v19  ;;  %s281_s13 = sshll.u32 %s370_s12, 4  ;;  %s282_s13 = int_to_ptr.vmem [resolvable:$true] %s281_s13 }
   0x6   :  { %312 = vmatpush3.msra.mxu0 %v24_v4  ;;  %319 = vmatpush3.msra.mxu1 %v31_v9  ;;  %v289_v13 = vld [vmem:[%s445_s2 + $0x20] ss:$0 sm:$0xff]  ;;  %v291_v20 = vld [vmem:[%s445_s2 + $0x48] ss:$0 sm:$0xff]  ;;  %v33_v25 = vld [vmem:[%s445_s2 + $0x50] sm:$0x1]  ;;  %p349_p1 = scmp.lt.s32.totalorder %s282_s13, %s282_s13 }
   0x7   :  { %313 = vmatprep.subr.mxu0 %v367_v2  ;;  %320 = vmatprep.subr.mxu1 %v367_v2  ;;  %s344_s14 = scalar_lea.vmem %s282_s13, 16  ;;  %s348_s15 = scalar_lea.vmem %s282_s13, 32 }
   0x8   :  { %314 = vmatpush3.msra.mxu0 %v23_v5  ;;  %321 = vmatpush3.msra.mxu1 %v30_v10  ;;  %p345_p0 = scmp.ne.s32.totalorder %s282_s13, %s344_s14  ;;  %p350_p2 = scmp.lt.s32.totalorder %s348_s15, %s344_s14 }
   0x9   :  { %329 = vmatprep.subr.mxu0 %v367_v2  ;;  %322 = vmatprep.subr.mxu1 %v367_v2 }
   0xa   :  { %323 = vmatpush3.msra.mxu1 %v29_v11  ;;  %194 = vperm.xlu0 %339, %v34_v18   ;;  %p351_p3 = por %p350_p2, %p349_p1 }
   0xb   :  { %324 = vmatprep.subr.mxu1 %v367_v2 }
   0xc   :  { %325 = vmatpush3.msra.mxu1 %v28_v12  ;;  %p352_p4 = pnand %p351_p3, %p345_p0 }
  0x74   :  { %v19_v7 = vpop.permute.xlu0 %18 }
  0x75   :  { %v22_v8 = vsel %vm21_vm1, %v15_v6, %v19_v7 }
  0x76   :  { %316 = vmatmul.mubr.msk.f32.vlgmr.msra.gmra.mxu0 %vm39_vm2, %v22_v8 }
  0x77   :  { %331 = vmatprep.mubr.msk.f32.mxu0 %vm368_vm0, %v367_v2 }
  0x85   :  { %v195_v26 = vpop.permute.xlu0 %194 }
 0x136   :  { %v109_v14 = vpop.f32.mrf.mxu0 }
 0x137   :  { %v110_v15 = vadd.f32 %v289_v13, %v109_v14 }
 0x138   :  { %v317_v16 = vpop.f32.mrf.mxu0 }
 0x139   :  { %340 = vtanh.f32 %v110_v15 }
 0x146   :  { %v341_v17 = vpop.eup %340 }
 0x147   :  { %327 = vmatmul.mubr.msk.f32.vlgmr.msra.gmra.mxu1 %vm39_vm2, %v341_v17 }
 0x207   :  { %v187_v21 = vpop.f32.mrf.mxu1 }
 0x208   :  { %v188_v22 = vadd.f32 %v291_v20, %v187_v21 }
 0x209   :  { %v328_v23 = vpop.f32.mrf.mxu1 }
 0x20a   :  { %342 = vtanh.f32 %v188_v22 }
 0x217   :  { %v343_v24 = vpop.eup %342 }
 0x218   :  { %330 = vmatpush3.xpose.msk.msra.mxu0 %vm39_vm2, %v343_v24 }
 0x21b   :  { %332 = vmatmul.mubr.msk.f32.vlgmr.msra.gmra.mxu0 %vm39_vm2, %v33_v25 }
 0x2db   :  { %v269_v27 = vpop.f32.mrf.mxu0 }
 0x2dc   :  { %v270_v28 = vadd.f32 %v269_v27, %v195_v26 }
 0x2dd   :  { %v333_v29 = vpop.f32.mrf.mxu0 }
 0x2de   :  { %274 = vst.msk [vmem:[#allocation2] sm:$0x1] %vm273_vm3, %v270_v28 }
 0x2df   :  { %355 = shalt.err (!%p352_p4)
}
 0x2e0   :  { %284 = dma.vmem_to_hbm [thread:$0]  %s282_s13, 16, %s446_s3, [#allocation3]  }
 0x2e1   :  { %364 = dma.done.wait [#allocation3], 16  }
 0x2e2   :  { %365 = vsyncadd [#allocation3], 4294967280 }
 0x2e3   :  { %288 = vsyncpa [#allocation3], 1 }

</bundles_post_ra>
